<compile_context>
chip_gen: v7x
topology: tpu7x:2x2x1
jax: 0.10.0
libtpu: 0.0.40
codegen_flags: <defaults>
</compile_context>

<pallas_src>
import functools

import jax
import jax.numpy as jnp
from jax.experimental import pallas as pl
from jax.experimental.pallas import tpu as pltpu


# ---------------------------------------------------------------------------
# Kernels
# ---------------------------------------------------------------------------
def _dot_trans_b(x_tile, w_tile):
    """x_tile (tm, tk) @ w_tile (tn, tk)^T -> (tm, tn), f32 accumulation on MXU."""
    lhs = x_tile
    if lhs.dtype != w_tile.dtype:          # e.g. f32 activations vs bf16 weights
        lhs = lhs.astype(w_tile.dtype)
    return jax.lax.dot_general(
        lhs, w_tile,
        dimension_numbers=(((1,), (1,)), ((), ())),
        preferred_element_type=jnp.float32,
    )


def _kernel_out_acc(x_ref, w_ref, b_ref, res_ref, o_ref, *, activation):
    """f32 output: accumulate directly into o_ref (resident across K), no scratch."""
    k = pl.program_id(2)

    @pl.when(k == 0)
    def _():
        o_ref[...] = jnp.broadcast_to(b_ref[...], o_ref.shape).astype(o_ref.dtype)

    o_ref[...] += _dot_trans_b(x_ref[...], w_ref[...])

    @pl.when(k == pl.num_programs(2) - 1)
    def _():
        o_ref[...] = (activation(o_ref[...]) + res_ref[...]).astype(o_ref.dtype)


def _kernel_scratch(x_ref, w_ref, b_ref, res_ref, o_ref, acc_ref, *, activation):
    """Non-f32 output: f32 VMEM scratch accumulator, single cast on the final write."""
    k = pl.program_id(2)

    @pl.when(k == 0)
    def _():
        acc_ref[...] = jnp.broadcast_to(
            b_ref[...].astype(jnp.float32), acc_ref.shape)

    acc_ref[...] += _dot_trans_b(x_ref[...], w_ref[...])

    @pl.when(k == pl.num_programs(2) - 1)
    def _():
        o_ref[...] = (activation(acc_ref[...])
                      + res_ref[...].astype(jnp.float32)).astype(o_ref.dtype)


# ---------------------------------------------------------------------------
# Tiling helpers
# ---------------------------------------------------------------------------
def _round_up(n, m):
    return ((n + m - 1) // m) * m


def _pick_tile(dim, target, align):
    """Largest multiple of `align` <= target that exactly divides `dim`."""
    if dim % align != 0 or dim <= align:
        return dim
    t = min(target, dim)
    t -= t % align
    while t > 0 and dim % t:
        t -= align
    return t if t > 0 else dim


def _vmem_budget_bytes():
    """~75% of per-core VMEM, capped at 96 MiB (128 MiB on v5e/v6e, 64 MiB on v7x)."""
    cap = 64 * 1024 * 1024
    try:
        info = pltpu.get_tpu_info()
        cap = int(getattr(info, "vmem_capacity_bytes", cap) or cap)
    except Exception:
        pass
    return min(int(cap * 3 // 4), 96 * 1024 * 1024)


def _footprint_bytes(tm, tn, tk, x_it, w_it, out_it, use_scratch):
    # double-buffered inputs (x LHS, W, bias [padded to 8 sublanes], residual)
    in_b = tm * tk * x_it + tn * tk * w_it + 8 * tn * x_it + tm * tn * x_it
    out_b = tm * tn * out_it
    acc_b = tm * tn * 4 if use_scratch else 0
    return 2 * (in_b + out_b) + acc_b


def _select_tiles(Bp, Hp, budget, x_it, w_it, out_it, use_scratch):
    # Weight single-pass: tm covers as much of B as possible.
    tm = _pick_tile(Bp, 1024, 8)
    # Keep >= 2 output-column blocks when H allows (v7x 2-TC megacore sharding).
    tn_target = min(512, Hp // 2) if Hp >= 256 else 512
    tn = _pick_tile(Hp, tn_target, 128)
    tk = _pick_tile(Hp, 1024, 128)

    while _footprint_bytes(tm, tn, tk, x_it, w_it, out_it, use_scratch) > budget:
        prev = (tm, tn, tk)
        if tk >= tn and tk > 128:
            tk = _pick_tile(Hp, max(tk // 2, 128), 128)
        elif tn > 128:
            tn = _pick_tile(Hp, max(tn // 2, 128), 128)
        elif tm > 8:
            tm = _pick_tile(Bp, max(tm // 2, 8), 8)
        else:
            break
        if (tm, tn, tk) == prev:
            break
    return tm, tn, tk


# ---------------------------------------------------------------------------
# Wrapper
# ---------------------------------------------------------------------------
def resnet_block(x, w, b, *, activation=jnp.tanh, weight_dtype=None,
                 tm=None, tn=None, tk=None):
    """activation(x @ w.T + b) + x   (PyTorch nn.Linear weight convention).

    weight_dtype: optionally stream the weight in a narrower dtype
    (e.g. jnp.bfloat16) while keeping f32 accumulation — halves weight HBM
    traffic and uses the MXU's native bf16 rate, at a small precision cost.
    """
    B, H = x.shape
    assert w.shape == (H, H), f"weight must be (H, H), got {w.shape}"
    assert b.shape == (H,), f"bias must be (H,), got {b.shape}"

    out_dtype = x.dtype
    if weight_dtype is not None:
        w = w.astype(weight_dtype)

    # Pad to TPU-friendly extents: batch -> multiple of 8, hidden -> multiple of 128.
    # Zero padding is exact for this op (tanh(0)=0, residual 0) and keeps tiles
    # bounded and stores unmasked/lane-dense; result is sliced back below.
    Bp, Hp = _round_up(B, 8), _round_up(H, 128)
    if (Bp, Hp) != (B, H):
        x_p = jnp.pad(x, ((0, Bp - B), (0, Hp - H)))
        w_p = jnp.pad(w, ((0, Hp - H), (0, Hp - H)))
        b_p = jnp.pad(b, ((0, Hp - H),))
    else:
        x_p, w_p, b_p = x, w, b
    b2 = b_p.reshape(1, Hp)

    x_it = x_p.dtype.itemsize
    w_it = w_p.dtype.itemsize
    out_it = jnp.dtype(out_dtype).itemsize
    use_out_acc = jnp.dtype(out_dtype) == jnp.dtype(jnp.float32)

    budget = _vmem_budget_bytes()
    atm, atn, atk = _select_tiles(Bp, Hp, budget, x_it, w_it, out_it,
                                  use_scratch=not use_out_acc)
    tm = atm if tm is None else tm
    tn = atn if tn is None else tn
    tk = atk if tk is None else tk
    assert Bp % tm == 0 and Hp % tn == 0 and Hp % tk == 0

    grid = (Bp // tm, Hp // tn, Hp // tk)  # reduction (K) axis last

    if use_out_acc:
        kernel = functools.partial(_kernel_out_acc, activation=activation)
        scratch = []
    else:
        kernel = functools.partial(_kernel_scratch, activation=activation)
        scratch = [pltpu.VMEM((tm, tn), jnp.float32)]

    cost = pl.CostEstimate(
        flops=2 * Bp * Hp * Hp,
        transcendentals=Bp * Hp,
        bytes_accessed=(2 * Bp * Hp * x_it        # x as LHS + residual (read)
                        + Hp * Hp * w_it          # weight (single pass target)
                        + Hp * x_it               # bias
                        + Bp * Hp * out_it),      # output write
    )

    out = pl.pallas_call(
        kernel,
        out_shape=jax.ShapeDtypeStruct((Bp, Hp), out_dtype),
        grid=grid,
        in_specs=[
            pl.BlockSpec((tm, tk), lambda i, j, k: (i, k)),   # x as matmul LHS
            pl.BlockSpec((tn, tk), lambda i, j, k: (j, k)),   # W (out, in): trans-B on MXU
            pl.BlockSpec((1, tn),  lambda i, j, k: (0, j)),   # bias, follows N only
            pl.BlockSpec((tm, tn), lambda i, j, k: (i, j)),   # x as residual
        ],
        out_specs=pl.BlockSpec((tm, tn), lambda i, j, k: (i, j)),
        scratch_shapes=scratch,
        compiler_params=pltpu.CompilerParams(
            dimension_semantics=("parallel", "parallel", "arbitrary"),
            vmem_limit_bytes=budget,
        ),
        cost_estimate=cost,
    )(x_p, w_p, b2, x_p)

    if (Bp, Hp) != (B, H):
        out = out[:B, :H]
    return out


if __name__ == "__main__":
    key = jax.random.PRNGKey(0)
    k_x, k_w, k_b = jax.random.split(key, 3)

    batch, hidden = 8, 32

    x = jax.random.normal(k_x, (batch, hidden), dtype=jnp.float32)
    # nn.Linear-style init (uniform in +-1/sqrt(hidden)), deterministic.
    bound = 1.0 / jnp.sqrt(jnp.float32(hidden))
    w = jax.random.uniform(k_w, (hidden, hidden), jnp.float32, -bound, bound)
    b = jax.random.uniform(k_b, (hidden,), jnp.float32, -bound, bound)

    out = resnet_block(x, w, b, activation=jnp.tanh)
    out = jax.block_until_ready(out)

    # Pure-JAX reference of the module's forward pass.
    ref = jnp.tanh(x @ w.T + b) + x
    assert out.shape == (batch, hidden)
    assert jnp.allclose(out, ref, atol=1e-5, rtol=1e-5), float(
        jnp.max(jnp.abs(out - ref))
    )

    print("KERNEL_OK")
</pallas_src>

<mosaic_0001>
module attributes {stable_mosaic.version = 11 : i64} {
  func.func @_kernel_out_acc(%arg0: i32, %arg1: i32, %arg2: i32, %arg3: memref<8x128xf32, #tpu.memory_space<vmem>>, %arg4: memref<128x128xf32, #tpu.memory_space<vmem>>, %arg5: memref<1x128xf32, #tpu.memory_space<vmem>>, %arg6: memref<8x128xf32, #tpu.memory_space<vmem>>, %arg7: memref<8x128xf32, #tpu.memory_space<vmem>>) attributes {dimension_semantics = [#tpu.dimension_semantics<parallel>, #tpu.dimension_semantics<parallel>, #tpu.dimension_semantics<arbitrary>], iteration_bounds = array<i64: 1, 1, 1>, scalar_prefetch = 0 : i64, scratch_operands = 0 : i64, tpu.core_type = #tpu.core_type<tc>, window_params = [{transform_indices = @transform_0, window_bounds = array<i64: 8, 128>}, {transform_indices = @transform_1, window_bounds = array<i64: 128, 128>}, {transform_indices = @transform_2, window_bounds = array<i64: 1, 128>}, {transform_indices = @transform_3, window_bounds = array<i64: 8, 128>}, {transform_indices = @transform_4, window_bounds = array<i64: 8, 128>}]} {
    %c0_i32 = arith.constant 0 : i32
    %0 = arith.cmpi eq, %arg2, %c0_i32 : i32
    %1 = arith.extui %0 : i1 to i32
    %c0_i32_0 = arith.constant 0 : i32
    %2 = arith.cmpi ne, %1, %c0_i32_0 : i32
    scf.if %2 {
      %c0_10 = arith.constant 0 : index
      %c0_11 = arith.constant 0 : index
      %12 = vector.load %arg5[%c0_10, %c0_11] : memref<1x128xf32, #tpu.memory_space<vmem>>, vector<1x128xf32>
      %13 = vector.shape_cast %12 : vector<1x128xf32> to vector<1x128xf32>
      %14 = vector.broadcast %13 : vector<1x128xf32> to vector<8x128xf32>
      %c0_12 = arith.constant 0 : index
      %c0_13 = arith.constant 0 : index
      %15 = vector.load %arg7[%c0_12, %c0_13] : memref<8x128xf32, #tpu.memory_space<vmem>>, vector<8x128xf32>
      tpu.vector_store %arg7[%c0_12, %c0_13], %14 {strides = array<i32>} : memref<8x128xf32, #tpu.memory_space<vmem>>, vector<8x128xf32>,
    } else {
    }
    %c0 = arith.constant 0 : index
    %c0_1 = arith.constant 0 : index
    %3 = vector.load %arg7[%c0, %c0_1] : memref<8x128xf32, #tpu.memory_space<vmem>>, vector<8x128xf32>
    %c0_2 = arith.constant 0 : index
    %c0_3 = arith.constant 0 : index
    %4 = vector.load %arg3[%c0_2, %c0_3] : memref<8x128xf32, #tpu.memory_space<vmem>>, vector<8x128xf32>
    %c0_4 = arith.constant 0 : index
    %c0_5 = arith.constant 0 : index
    %5 = vector.load %arg4[%c0_4, %c0_5] : memref<128x128xf32, #tpu.memory_space<vmem>>, vector<128x128xf32>
    %cst = arith.constant dense<0.000000e+00> : vector<8x128xf32>
    %6 = tpu.matmul %4, %5, %cst {dimension_numbers = #tpu.dot_dimension_numbers<[1], [1], [0], [0], [0, 0, 1, 0], [], []>} : vector<8x128xf32>, vector<128x128xf32>, vector<8x128xf32> -> vector<8x128xf32>
    %7 = arith.addf %3, %6 : vector<8x128xf32>
    %c0_6 = arith.constant 0 : index
    %c0_7 = arith.constant 0 : index
    %8 = vector.load %arg7[%c0_6, %c0_7] : memref<8x128xf32, #tpu.memory_space<vmem>>, vector<8x128xf32>
    tpu.vector_store %arg7[%c0_6, %c0_7], %7 {strides = array<i32>} : memref<8x128xf32, #tpu.memory_space<vmem>>, vector<8x128xf32>,
    %c0_i32_8 = arith.constant 0 : i32
    %9 = arith.cmpi eq, %arg2, %c0_i32_8 : i32
    %10 = arith.extui %9 : i1 to i32
    %c0_i32_9 = arith.constant 0 : i32
    %11 = arith.cmpi ne, %10, %c0_i32_9 : i32
    scf.if %11 {
      %c0_10 = arith.constant 0 : index
      %c0_11 = arith.constant 0 : index
      %12 = vector.load %arg7[%c0_10, %c0_11] : memref<8x128xf32, #tpu.memory_space<vmem>>, vector<8x128xf32>
      %13 = math.tanh %12 : vector<8x128xf32>
      %c0_12 = arith.constant 0 : index
      %c0_13 = arith.constant 0 : index
      %14 = vector.load %arg6[%c0_12, %c0_13] : memref<8x128xf32, #tpu.memory_space<vmem>>, vector<8x128xf32>
      %15 = arith.addf %13, %14 : vector<8x128xf32>
      %c0_14 = arith.constant 0 : index
      %c0_15 = arith.constant 0 : index
      %16 = vector.load %arg7[%c0_14, %c0_15] : memref<8x128xf32, #tpu.memory_space<vmem>>, vector<8x128xf32>
      tpu.vector_store %arg7[%c0_14, %c0_15], %15 {strides = array<i32>} : memref<8x128xf32, #tpu.memory_space<vmem>>, vector<8x128xf32>,
    } else {
    }
    return
  }
  func.func @transform_0(%arg0: i32, %arg1: i32, %arg2: i32) -> (i32, i32) {
    %c0_i32 = arith.constant 0 : i32
    return %arg0, %arg2 : i32, i32
  }
  func.func @transform_1(%arg0: i32, %arg1: i32, %arg2: i32) -> (i32, i32) {
    %c0_i32 = arith.constant 0 : i32
    return %arg1, %arg2 : i32, i32
  }
  func.func @transform_2(%arg0: i32, %arg1: i32, %arg2: i32) -> (i32, i32) {
    %c0_i32 = arith.constant 0 : i32
    %c0_i32_0 = arith.constant 0 : i32
    return %c0_i32, %arg1 : i32, i32
  }
  func.func @transform_3(%arg0: i32, %arg1: i32, %arg2: i32) -> (i32, i32) {
    %c0_i32 = arith.constant 0 : i32
    return %arg0, %arg1 : i32, i32
  }
  func.func @transform_4(%arg0: i32, %arg1: i32, %arg2: i32) -> (i32, i32) {
    %c0_i32 = arith.constant 0 : i32
    return %arg0, %arg1 : i32, i32
  }
}

</mosaic_0001>

<bundles_post_ra>
// kernel: tpu_custom_call.1
= control target key start
LH: loop header
LB: loop body
LE: loop exit
PB: predicated region body
PF: predicated region fallthrough
CT: control target
= control target key end

     0   :  { %9 = vsyncpa [#allocation3], 0  ;;  %s411_s0 = inlined_call_operand.hbm [shape: f32[8,128], index: 0, kind: input, shape index: {}]   ;;  %s412_s1 = inlined_call_operand.hbm [shape: f32[128,128], index: 1, kind: input, shape index: {}]   ;;  %s413_s2 = inlined_call_operand.vmem [shape: f32[1,128], index: 2, kind: input, shape index: {}]   ;;  %s414_s3 = inlined_call_operand.vmem [shape: f32[8,128], index: 3, kind: input, shape index: {}]   ;;  %s415_s4 = inlined_call_operand.hbm [shape: f32[8,128], index: 4, kind: output, shape index: {}]  }
   0x1   :  { %10 = vsyncpa [#allocation6], 0 }
   0x2   :  { %11 = vsyncpa [#allocation4], 0  ;;  %s329_s15 = smov [#allocation2]   ;;  %s330_s17 = smov [#allocation5]  }
   0x3   :  { %s18_s16 = sshll.u32 %s329_s15, 4  ;;  %s27_s18 = sshll.u32 %s330_s17, 4  ;;  %s19_s16 = int_to_ptr.vmem [resolvable:$true] %s18_s16  ;;  %s362_s18 = int_to_ptr.vmem [resolvable:$true] %s27_s18 }
   0x4   :  { %s257_s21 = scalar_lea.hbm %s411_s0, 128 }
   0x5   :  { %p258_p0 = scmp.ne.s32.totalorder %s411_s0, %s257_s21  ;;  %p261_p1 = scmp.lt.u32.totalorder %s257_s21, %s411_s0 }
   0x7   :  { %p263_p2 = pnand %p261_p1, %p258_p0 }
   0x9   :  { %266 = shalt.err (!%p263_p2)
}
   0xa   :  { %s267_s26 = scalar_lea.vmem %s19_s16, 128  ;;  %p272_p4 = scmp.lt.s32.totalorder %s19_s16, %s19_s16 }
   0xb   :  { %p268_p3 = scmp.ne.s32.totalorder %s19_s16, %s267_s26  ;;  %p273_p5 = scmp.lt.s32.totalorder %s267_s26, %s267_s26 }
   0xd   :  { %p274_p6 = por %p273_p5, %p272_p4 }
   0xf   :  { %p275_p7 = pnand %p274_p6, %p268_p3 }
  0x11   :  { %278 = shalt.err (!%p275_p7)
}
  0x12   :  { %21 = dma.hbm_to_vmem [thread:$0]  %s411_s0, 128, %s19_s16, [#allocation3]  }
  0x13   :  { %s279_s5 = scalar_lea.hbm %s412_s1, 2048 }
  0x14   :  { %p280_p8 = scmp.ne.s32.totalorder %s412_s1, %s279_s5  ;;  %p283_p9 = scmp.lt.u32.totalorder %s279_s5, %s412_s1 }
  0x16   :  { %p285_p10 = pnand %p283_p9, %p280_p8 }
  0x18   :  { %288 = shalt.err (!%p285_p10)
}
  0x19   :  { %s289_s10 = scalar_lea.vmem %s362_s18, 2048  ;;  %p294_p12 = scmp.lt.s32.totalorder %s362_s18, %s362_s18 }
  0x1a   :  { %p290_p11 = scmp.ne.s32.totalorder %s362_s18, %s289_s10  ;;  %p295_p13 = scmp.lt.s32.totalorder %s289_s10, %s289_s10 }
  0x1c   :  { %p296_p0 = por %p295_p13, %p294_p12 }
  0x1e   :  { %p297_p1 = pnand %p296_p0, %p290_p11 }
  0x20   :  { %300 = shalt.err (!%p297_p1)
}
  0x21   :  { %s331_s0 = smov 128   ;;  %s332_s11 = smov 8  }
  0x22   :  { %33 = dma.hbm_to_vmem [thread:$0]  %s412_s1, 2048, %s362_s18, [#allocation6], %s331_s0, %s331_s0, %s332_s11  }
  0x23   :  { %323 = dma.done.wait [#allocation3], 128  }
  0x24   :  { %324 = vsyncadd [#allocation3], 4294967168 }
  0x25   :  { %325 = dma.done.wait [#allocation6], 2048  }
  0x26   :  { %326 = vsyncadd [#allocation6], 4294965248  ;;  %v333_v0 = vmov 0.0|0.0   ;;  %vm334_vm0 = vmmov 0   ;;  %v335_v1 = vmov 0.0   ;;  %v58_v2 = vld [vmem:[#allocation5] sm:$0xff] }
  0x27   :  { %223 = vmatprep.subr.bf16.mxu0 %v333_v0  ;;  %220 = vmatprep.mubr.msk.f32.mxu0 %vm334_vm0, %v335_v1  ;;  %v59_v3 = vld [vmem:[#allocation5 + $0x8] sm:$0xff]  ;;  %v60_v5 = vld [vmem:[#allocation5 + $0x10] sm:$0xff]  ;;  %v61_v6 = vld [vmem:[#allocation5 + $0x18] sm:$0xff]  ;;  %s336_s17 = smov [#allocation7]  }
  0x28   :  { %v224_v4 = vpack.c.bf16 %v59_v3, %v58_v2  ;;  %v227_v7 = vpack.c.bf16 %v61_v6, %v60_v5  ;;  %v62_v8 = vld [vmem:[#allocation5 + $0x20] sm:$0xff]  ;;  %v63_v9 = vld [vmem:[#allocation5 + $0x28] sm:$0xff]  ;;  %v64_v11 = vld [vmem:[#allocation5 + $0x30] sm:$0xff]  ;;  %s160_s18 = sshll.u32 %s336_s17, 4  ;;  %s161_s18 = int_to_ptr.vmem [resolvable:$true] %s160_s18 }
  0x29   :  { %v230_v10 = vpack.c.bf16 %v63_v9, %v62_v8  ;;  %v65_v12 = vld [vmem:[#allocation5 + $0x38] sm:$0xff]  ;;  %v66_v14 = vld [vmem:[#allocation5 + $0x40] sm:$0xff]  ;;  %v67_v15 = vld [vmem:[#allocation5 + $0x48] sm:$0xff]  ;;  %s301_s19 = scalar_lea.vmem %s161_s18, 128  ;;  %p306_p3 = scmp.lt.s32.totalorder %s161_s18, %s161_s18 }
  0x2a   :  { %225 = vmatpush3.bf16.xpose.msra.mxu0 %v224_v4  ;;  %v233_v13 = vpack.c.bf16 %v65_v12, %v64_v11  ;;  %v236_v16 = vpack.c.bf16 %v67_v15, %v66_v14  ;;  %v68_v17 = vld [vmem:[#allocation5 + $0x50] sm:$0xff]  ;;  %v69_v18 = vld [vmem:[#allocation5 + $0x58] sm:$0xff]  ;;  %v70_v20 = vld [vmem:[#allocation5 + $0x60] sm:$0xff]  ;;  %p302_p2 = scmp.ne.s32.totalorder %s161_s18, %s301_s19  ;;  %p307_p4 = scmp.lt.s32.totalorder %s301_s19, %s301_s19 }
  0x2b   :  { %226 = vmatprep.subr.bf16.mxu0 %v333_v0  ;;  %v239_v19 = vpack.c.bf16 %v69_v18, %v68_v17  ;;  %v71_v21 = vld [vmem:[#allocation5 + $0x68] sm:$0xff]  ;;  %v72_v23 = vld [vmem:[#allocation5 + $0x70] sm:$0xff]  ;;  %v73_v24 = vld [vmem:[#allocation5 + $0x78] sm:$0xff] }
  0x2c   :  { %v242_v22 = vpack.c.bf16 %v71_v21, %v70_v20  ;;  %v245_v25 = vpack.c.bf16 %v73_v24, %v72_v23  ;;  %v57_v26 = vld [vmem:[#allocation2] sm:$0xff]  ;;  %p308_p5 = por %p307_p4, %p306_p3 }
  0x2d   :  { %v170_v27 = vld [vmem:[%s413_s2] ss:$0 sm:$0xff] }
  0x2e   :  { %v151_v31 = vld [vmem:[%s414_s3] sm:$0xff]  ;;  %p309_p6 = pnand %p308_p5, %p302_p2 }
  0x32   :  { %228 = vmatpush3.bf16.xpose.msra.mxu0 %v227_v7 }
  0x33   :  { %229 = vmatprep.subr.bf16.mxu0 %v333_v0 }
  0x3a   :  { %231 = vmatpush3.bf16.xpose.msra.mxu0 %v230_v10 }
  0x3b   :  { %232 = vmatprep.subr.bf16.mxu0 %v333_v0 }
  0x42   :  { %234 = vmatpush3.bf16.xpose.msra.mxu0 %v233_v13 }
  0x43   :  { %235 = vmatprep.subr.bf16.mxu0 %v333_v0 }
  0x4a   :  { %237 = vmatpush3.bf16.xpose.msra.mxu0 %v236_v16 }
  0x4b   :  { %238 = vmatprep.subr.bf16.mxu0 %v333_v0 }
  0x52   :  { %240 = vmatpush3.bf16.xpose.msra.mxu0 %v239_v19 }
  0x53   :  { %241 = vmatprep.subr.bf16.mxu0 %v333_v0 }
  0x5a   :  { %243 = vmatpush3.bf16.xpose.msra.mxu0 %v242_v22 }
  0x5b   :  { %244 = vmatprep.subr.bf16.mxu0 %v333_v0 }
  0x62   :  { %246 = vmatpush3.bf16.xpose.msra.mxu0 %v245_v25 }
  0x69   :  { %221 = vmatmul.mubr.f32.vlgmr.msra.gmra.mrb[0].mxu0 %v57_v26 }
 0x13c   :  { %v140_v28 = vpop.f32.mrb[0].mxu0 }
 0x13d   :  { %v144_v29 = vadd.f32 %v170_v27, %v140_v28  ;;  %v222_v30 = vpop.f32.mrb[1].mxu0 }
 0x13f   :  { %255 = vtanh.f32 %v144_v29 }
 0x149   :  { %v256_v32 = vpop.eup %255 }
 0x14a   :  { %v152_v33 = vadd.f32 %v256_v32, %v151_v31 }
 0x14c   :  { %153 = vst [vmem:[#allocation7] sm:$0xff] %v152_v33 }
 0x14d   :  { %312 = shalt.err (!%p309_p6)
}
 0x14e   :  { %s313_s21 = scalar_lea.hbm %s415_s4, 128 }
 0x14f   :  { %p314_p7 = scmp.ne.s32.totalorder %s415_s4, %s313_s21  ;;  %p317_p8 = scmp.lt.u32.totalorder %s313_s21, %s415_s4 }
 0x151   :  { %p319_p9 = pnand %p317_p8, %p314_p7 }
 0x153   :  { %322 = shalt.err (!%p319_p9)
}
 0x154   :  { %163 = dma.vmem_to_hbm [thread:$0]  %s161_s18, 128, %s415_s4, [#allocation4]  }
 0x155   :  { %327 = dma.done.wait [#allocation4], 128  }
 0x156   :  { %328 = vsyncadd [#allocation4], 4294967168 }
 0x157   :  { %167 = vsyncpa [#allocation3], 1 }
 0x158   :  { %168 = vsyncpa [#allocation6], 1 }
 0x159   :  { %169 = vsyncpa [#allocation4], 1 }

</bundles_post_ra>
